<compile_context>
chip_gen: v7x
topology: tpu7x:2x2x1
jax: 0.10.0
libtpu: 0.0.40
codegen_flags: <defaults>
</compile_context>

<pallas_src>
import jax
import jax.numpy as jnp
from jax.experimental import pallas as pl
from jax.experimental.pallas import tpu as pltpu

WEIGHT = 0.1
EPS = 1e-8
_DEFAULT_TILE_BYTES = 2 * 1024 * 1024
_VMEM_LIMIT_BYTES = 32 * 1024 * 1024


def _pick_td(d, plane_bytes, budget_bytes):
    """Largest divisor of d whose tile (td planes) fits the byte budget."""
    td = 1
    for t in range(1, d + 1):
        if d % t == 0 and t * plane_bytes <= budget_bytes:
            td = t
    return td


def _edge_scale(n, axis):
    """(1,n,1)/(1,1,n) scale vector: 1.0 on the two edge rows, 0.5 inside."""
    shape = [1, 1, 1]
    shape[axis] = n
    idx = jax.lax.broadcasted_iota(jnp.int32, tuple(shape), axis)
    return jnp.where((idx == 0) | (idx == n - 1), 1.0, 0.5).astype(jnp.float32)


def _shift_clamped(x, axis, direction):
    """y[i] = x[clamp(i + direction, 0, n-1)] along `axis` (fallback path)."""
    n = x.shape[axis]
    if direction == +1:
        body = jax.lax.slice_in_dim(x, 1, n, axis=axis)
        edge = jax.lax.slice_in_dim(x, n - 1, n, axis=axis)
        return jax.lax.concatenate([body, edge], dimension=axis)
    edge = jax.lax.slice_in_dim(x, 0, 1, axis=axis)
    body = jax.lax.slice_in_dim(x, 0, n - 1, axis=axis)
    return jax.lax.concatenate([edge, body], dimension=axis)


def _grad_inner(x, axis, use_roll):
    """torch.gradient along a lane/sublane axis of the (TD, H, W) tile.

    Only the square of the result is consumed downstream, so the sign of the
    interior difference is irrelevant; the two edge rows are always written
    with the exact one-sided difference.
    """
    n = x.shape[axis]
    if use_roll:
        # Wrap-around rotations run on the XLU, which is otherwise idle here.
        p = pltpu.roll(x, n - 1, axis)   # x[(i+1) % n]  (sign-insensitive interior)
        m = pltpu.roll(x, 1, axis)       # x[(i-1) % n]
        g = (p - m) * 0.5
        lo = (jax.lax.slice_in_dim(x, 1, 2, axis=axis)
              - jax.lax.slice_in_dim(x, 0, 1, axis=axis))            # x[1]-x[0]
        hi = (jax.lax.slice_in_dim(x, n - 1, n, axis=axis)
              - jax.lax.slice_in_dim(x, n - 2, n - 1, axis=axis))    # x[n-1]-x[n-2]
        shape = [1, 1, 1]
        shape[axis] = n
        idx = jax.lax.broadcasted_iota(jnp.int32, tuple(shape), axis)
        g = jnp.where(idx == 0, lo, g)
        g = jnp.where(idx == n - 1, hi, g)
        return g
    # Fallback for non-native lane widths (e.g. W < 128): clamped shifts plus
    # a tiny broadcast edge-scale vector (no full-volume masks).
    xp = _shift_clamped(x, axis, +1)
    xm = _shift_clamped(x, axis, -1)
    return (xp - xm) * _edge_scale(n, axis)


def _make_kernel(TD, D, H, W):
    # Use pltpu.roll only when the tile layout is lane/sublane native.
    roll_w = (W % 128 == 0)
    roll_h = (W % 128 == 0) and (H % 8 == 0)

    def kernel(x_ref, xl_ref, xr_ref, out_ref):
        dt = pl.program_id(1)                    # D-tile index ("arbitrary" axis)

        @pl.when(dt == 0)
        def _init():
            out_ref[...] = jnp.zeros_like(out_ref)

        x = x_ref[0].astype(jnp.float32)         # (TD, H, W)
        xl = xl_ref[0, 0].astype(jnp.float32)    # (H, W): plane clamp(d0 - 1, 0)
        xr = xr_ref[0, 0].astype(jnp.float32)    # (H, W): plane clamp(d0 + TD, D-1)

        # Gradients along H (sublanes) and W (lanes).
        dh = _grad_inner(x, 1, roll_h)
        dw = _grad_inner(x, 2, roll_w)
        s_hw = dh * dh + dw * dw                 # (TD, H, W)

        d0 = dt * TD                             # global index of first plane

        # --- D gradient, first plane of the tile (uses left halo) ---
        if TD == 1:
            nxt = xr
            scale0 = jnp.where((d0 == 0) | (d0 == D - 1), 1.0, 0.5)
        else:
            nxt = x[1]
            scale0 = jnp.where(d0 == 0, 1.0, 0.5)
        dd0 = (nxt - xl) * scale0
        contrib = jnp.sqrt(s_hw[0] + dd0 * dd0 + EPS)            # (H, W)

        # --- D gradient, last plane of the tile (uses right halo) ---
        if TD >= 2:
            scale1 = jnp.where(d0 + TD == D, 1.0, 0.5)
            dd1 = (xr - x[TD - 2]) * scale1
            contrib = contrib + jnp.sqrt(s_hw[TD - 1] + dd1 * dd1 + EPS)

        # --- D gradient, interior planes: central diff from plain slices ---
        if TD >= 3:
            ddi = (x[2:TD] - x[0:TD - 2]) * 0.5                  # (TD-2, H, W)
            gmi = jnp.sqrt(s_hw[1:TD - 1] + ddi * ddi + EPS)
            # reduce over the outer (non-lane/sublane) axis: plain VALU adds
            contrib = contrib + jnp.sum(gmi, axis=0)

        # Per-(b,c) partial sum, accumulated in the VMEM-resident output block.
        out_ref[0] += contrib

    return kernel


def diffusion_regularizer(displacement, weight=WEIGHT,
                          tile_bytes=_DEFAULT_TILE_BYTES):
    """displacement: (B, 3, D, H, W) float -> scalar loss (float32)."""
    B, C, D0, H0, W0 = displacement.shape
    if min(D0, H0, W0) < 2:
        raise ValueError("spatial dims must be >= 2 (as torch.gradient requires)")

    x = displacement.reshape(B * C, D0, H0, W0)

    # The loss is symmetric in the three spatial gradients -> permute spatial
    # axes so the largest extent is last (lane-dense), smallest is the tiled axis.
    perm = sorted(range(3), key=lambda a: (D0, H0, W0)[a])
    if tuple(perm) != (0, 1, 2):
        x = jnp.transpose(x, (0,) + tuple(1 + p for p in perm))
    BC, D, H, W = x.shape

    TD = _pick_td(D, H * W * 4, tile_bytes)
    nD = D // TD

    kernel = _make_kernel(TD, D, H, W)

    in_specs = [
        # main D-tile
        pl.BlockSpec((1, TD, H, W), lambda bc, dt: (bc, dt, 0, 0)),
        # one-plane halos (block size 1 along D => block index == plane index)
        pl.BlockSpec((1, 1, H, W),
                     lambda bc, dt: (bc, jnp.maximum(dt * TD - 1, 0), 0, 0)),
        pl.BlockSpec((1, 1, H, W),
                     lambda bc, dt: (bc, jnp.minimum((dt + 1) * TD, D - 1), 0, 0)),
    ]
    out_spec = pl.BlockSpec((1, H, W), lambda bc, dt: (bc, 0, 0))

    partials = pl.pallas_call(
        kernel,
        out_shape=jax.ShapeDtypeStruct((BC, H, W), jnp.float32),
        grid_spec=pltpu.PrefetchScalarGridSpec(
            num_scalar_prefetch=0,
            grid=(BC, nD),
            in_specs=in_specs,
            out_specs=out_spec,
        ),
        compiler_params=pltpu.CompilerParams(
            dimension_semantics=("parallel", "arbitrary"),
            vmem_limit_bytes=_VMEM_LIMIT_BYTES,
        ),
    )(x, x, x)

    n_elems = BC * D * H * W
    total = jnp.sum(partials, dtype=jnp.float32)
    return (weight * total / n_elems).astype(jnp.float32)


if __name__ == "__main__":
    key = jax.random.PRNGKey(0)
    B, C, D, H, W = 2, 3, 8, 16, 16
    displacement = jax.random.normal(key, (B, C, D, H, W), dtype=jnp.float32)

    def reference(disp):
        dx = jnp.gradient(disp, axis=2)
        dy = jnp.gradient(disp, axis=3)
        dz = jnp.gradient(disp, axis=4)
        return WEIGHT * jnp.sqrt(dx ** 2 + dy ** 2 + dz ** 2 + EPS).mean()

    ref = reference(displacement)

    # default tiling (single D tile at this size)
    loss = jax.block_until_ready(diffusion_regularizer(displacement))
    assert jnp.allclose(loss, ref, rtol=1e-4, atol=1e-6), (float(loss), float(ref))

    # force multi-tile paths (TD=2 and TD=4) to exercise halos / boundary scales
    for forced_tile_bytes in (2 * H * W * 4, 4 * H * W * 4):
        loss_t = jax.block_until_ready(
            diffusion_regularizer(displacement, tile_bytes=forced_tile_bytes))
        assert jnp.allclose(loss_t, ref, rtol=1e-4, atol=1e-6), (
            forced_tile_bytes, float(loss_t), float(ref))

    # exercise the "largest spatial dim last" re-layout path
    disp_p = jax.random.normal(jax.random.PRNGKey(1), (B, C, 16, 16, 8),
                               dtype=jnp.float32)
    loss_p = jax.block_until_ready(diffusion_regularizer(disp_p))
    assert jnp.allclose(loss_p, reference(disp_p), rtol=1e-4, atol=1e-6)

    print("KERNEL_OK")
</pallas_src>

<mosaic_0001>
module attributes {stable_mosaic.version = 11 : i64} {
  func.func @kernel(%arg0: i32, %arg1: i32, %arg2: memref<1x8x16x16xf32, #tpu.memory_space<vmem>>, %arg3: memref<1x1x16x16xf32, #tpu.memory_space<vmem>>, %arg4: memref<1x1x16x16xf32, #tpu.memory_space<vmem>>, %arg5: memref<1x16x16xf32, #tpu.memory_space<vmem>>) attributes {dimension_semantics = [#tpu.dimension_semantics<parallel>, #tpu.dimension_semantics<arbitrary>], iteration_bounds = array<i64: 6, 1>, scalar_prefetch = 0 : i64, scratch_operands = 0 : i64, tpu.core_type = #tpu.core_type<tc>, window_params = [{transform_indices = @transform_0, window_bounds = array<i64: 1, 8, 16, 16>}, {transform_indices = @transform_1, window_bounds = array<i64: 1, 1, 16, 16>}, {transform_indices = @transform_2, window_bounds = array<i64: 1, 1, 16, 16>}, {transform_indices = @transform_3, window_bounds = array<i64: 1, 16, 16>}]} {
    %c0_i32 = arith.constant 0 : i32
    %0 = arith.cmpi eq, %arg1, %c0_i32 : i32
    %1 = arith.extui %0 : i1 to i32
    %c0_i32_0 = arith.constant 0 : i32
    %2 = arith.cmpi ne, %1, %c0_i32_0 : i32
    scf.if %2 {
      %cst_36 = arith.constant 0.000000e+00 : f32
      %98 = vector.broadcast %cst_36 : f32 to vector<1x16x16xf32>
      %c0_37 = arith.constant 0 : index
      %c0_38 = arith.constant 0 : index
      %c0_39 = arith.constant 0 : index
      %99 = vector.load %arg5[%c0_37, %c0_38, %c0_39] : memref<1x16x16xf32, #tpu.memory_space<vmem>>, vector<1x16x16xf32>
      tpu.vector_store %arg5[%c0_37, %c0_38, %c0_39], %98 {strides = array<i32>} : memref<1x16x16xf32, #tpu.memory_space<vmem>>, vector<1x16x16xf32>,
    } else {
    }
    %c0 = arith.constant 0 : index
    %c0_1 = arith.constant 0 : index
    %c0_2 = arith.constant 0 : index
    %c0_3 = arith.constant 0 : index
    %3 = vector.load %arg2[%c0, %c0_1, %c0_2, %c0_3] : memref<1x8x16x16xf32, #tpu.memory_space<vmem>>, vector<1x8x16x16xf32>
    %4 = vector.shape_cast %3 : vector<1x8x16x16xf32> to vector<8x16x16xf32>
    %c0_4 = arith.constant 0 : index
    %c0_5 = arith.constant 0 : index
    %c0_6 = arith.constant 0 : index
    %c0_7 = arith.constant 0 : index
    %5 = vector.load %arg3[%c0_4, %c0_5, %c0_6, %c0_7] : memref<1x1x16x16xf32, #tpu.memory_space<vmem>>, vector<1x1x16x16xf32>
    %6 = vector.shape_cast %5 : vector<1x1x16x16xf32> to vector<16x16xf32>
    %c0_8 = arith.constant 0 : index
    %c0_9 = arith.constant 0 : index
    %c0_10 = arith.constant 0 : index
    %c0_11 = arith.constant 0 : index
    %7 = vector.load %arg4[%c0_8, %c0_9, %c0_10, %c0_11] : memref<1x1x16x16xf32, #tpu.memory_space<vmem>>, vector<1x1x16x16xf32>
    %8 = vector.shape_cast %7 : vector<1x1x16x16xf32> to vector<16x16xf32>
    %9 = vector.extract_strided_slice %4 {offsets = [0, 1, 0], sizes = [8, 15, 16], strides = [1, 1, 1]} : vector<8x16x16xf32> to vector<8x15x16xf32>
    %10 = vector.extract_strided_slice %4 {offsets = [0, 15, 0], sizes = [8, 1, 16], strides = [1, 1, 1]} : vector<8x16x16xf32> to vector<8x1x16xf32>
    %11 = tpu.concatenate %9, %10 in 1 : vector<8x15x16xf32>, vector<8x1x16xf32> -> vector<8x16x16xf32>
    %12 = vector.extract_strided_slice %4 {offsets = [0, 0, 0], sizes = [8, 1, 16], strides = [1, 1, 1]} : vector<8x16x16xf32> to vector<8x1x16xf32>
    %13 = vector.extract_strided_slice %4 {offsets = [0, 0, 0], sizes = [8, 15, 16], strides = [1, 1, 1]} : vector<8x16x16xf32> to vector<8x15x16xf32>
    %14 = tpu.concatenate %12, %13 in 1 : vector<8x1x16xf32>, vector<8x15x16xf32> -> vector<8x16x16xf32>
    %15 = arith.subf %11, %14 : vector<8x16x16xf32>
    %16 = tpu.iota {dimensions = array<i32: 1>} : vector<1x16x1xi32>
    %c0_i32_12 = arith.constant 0 : i32
    %17 = vector.broadcast %c0_i32_12 : i32 to vector<1x16x1xi32>
    %18 = arith.cmpi eq, %16, %17 : vector<1x16x1xi32>
    %c15_i32 = arith.constant 15 : i32
    %19 = vector.broadcast %c15_i32 : i32 to vector<1x16x1xi32>
    %20 = arith.cmpi eq, %16, %19 : vector<1x16x1xi32>
    %21 = arith.ori %18, %20 : vector<1x16x1xi1>
    %cst = arith.constant 1.000000e+00 : f32
    %cst_13 = arith.constant 5.000000e-01 : f32
    %22 = vector.broadcast %cst : f32 to vector<1x16x1xf32>
    %23 = vector.broadcast %cst_13 : f32 to vector<1x16x1xf32>
    %24 = arith.select %21, %22, %23 : vector<1x16x1xi1>, vector<1x16x1xf32>
    %25 = vector.broadcast %24 : vector<1x16x1xf32> to vector<8x16x16xf32>
    %26 = arith.mulf %15, %25 : vector<8x16x16xf32>
    %27 = vector.extract_strided_slice %4 {offsets = [0, 0, 1], sizes = [8, 16, 15], strides = [1, 1, 1]} : vector<8x16x16xf32> to vector<8x16x15xf32>
    %28 = vector.extract_strided_slice %4 {offsets = [0, 0, 15], sizes = [8, 16, 1], strides = [1, 1, 1]} : vector<8x16x16xf32> to vector<8x16x1xf32>
    %29 = tpu.concatenate %27, %28 in 2 : vector<8x16x15xf32>, vector<8x16x1xf32> -> vector<8x16x16xf32>
    %30 = vector.extract_strided_slice %4 {offsets = [0, 0, 0], sizes = [8, 16, 1], strides = [1, 1, 1]} : vector<8x16x16xf32> to vector<8x16x1xf32>
    %31 = vector.extract_strided_slice %4 {offsets = [0, 0, 0], sizes = [8, 16, 15], strides = [1, 1, 1]} : vector<8x16x16xf32> to vector<8x16x15xf32>
    %32 = tpu.concatenate %30, %31 in 2 : vector<8x16x1xf32>, vector<8x16x15xf32> -> vector<8x16x16xf32>
    %33 = arith.subf %29, %32 : vector<8x16x16xf32>
    %34 = tpu.iota {dimensions = array<i32: 2>} : vector<1x1x16xi32>
    %c0_i32_14 = arith.constant 0 : i32
    %35 = vector.broadcast %c0_i32_14 : i32 to vector<1x1x16xi32>
    %36 = arith.cmpi eq, %34, %35 : vector<1x1x16xi32>
    %c15_i32_15 = arith.constant 15 : i32
    %37 = vector.broadcast %c15_i32_15 : i32 to vector<1x1x16xi32>
    %38 = arith.cmpi eq, %34, %37 : vector<1x1x16xi32>
    %39 = arith.ori %36, %38 : vector<1x1x16xi1>
    %cst_16 = arith.constant 1.000000e+00 : f32
    %cst_17 = arith.constant 5.000000e-01 : f32
    %40 = vector.broadcast %cst_16 : f32 to vector<1x1x16xf32>
    %41 = vector.broadcast %cst_17 : f32 to vector<1x1x16xf32>
    %42 = arith.select %39, %40, %41 : vector<1x1x16xi1>, vector<1x1x16xf32>
    %43 = vector.broadcast %42 : vector<1x1x16xf32> to vector<8x16x16xf32>
    %44 = arith.mulf %33, %43 : vector<8x16x16xf32>
    %45 = arith.mulf %26, %26 : vector<8x16x16xf32>
    %46 = arith.mulf %44, %44 : vector<8x16x16xf32>
    %47 = arith.addf %45, %46 : vector<8x16x16xf32>
    %c8_i32 = arith.constant 8 : i32
    %48 = arith.muli %arg1, %c8_i32 : i32
    %49 = vector.extract_strided_slice %4 {offsets = [1, 0, 0], sizes = [1, 16, 16], strides = [1, 1, 1]} : vector<8x16x16xf32> to vector<1x16x16xf32>
    %50 = vector.shape_cast %49 : vector<1x16x16xf32> to vector<16x16xf32>
    %c0_i32_18 = arith.constant 0 : i32
    %51 = arith.cmpi eq, %48, %c0_i32_18 : i32
    %cst_19 = arith.constant 1.000000e+00 : f32
    %cst_20 = arith.constant 5.000000e-01 : f32
    %52 = arith.select %51, %cst_19, %cst_20 : f32
    %53 = arith.subf %50, %6 : vector<16x16xf32>
    %54 = vector.broadcast %52 : f32 to vector<16x16xf32>
    %55 = arith.mulf %53, %54 : vector<16x16xf32>
    %56 = vector.extract_strided_slice %47 {offsets = [0, 0, 0], sizes = [1, 16, 16], strides = [1, 1, 1]} : vector<8x16x16xf32> to vector<1x16x16xf32>
    %57 = vector.shape_cast %56 : vector<1x16x16xf32> to vector<16x16xf32>
    %58 = arith.mulf %55, %55 : vector<16x16xf32>
    %59 = arith.addf %57, %58 : vector<16x16xf32>
    %cst_21 = arith.constant 9.99999993E-9 : f32
    %60 = vector.broadcast %cst_21 : f32 to vector<16x16xf32>
    %61 = arith.addf %59, %60 : vector<16x16xf32>
    %62 = math.sqrt %61 : vector<16x16xf32>
    %c8_i32_22 = arith.constant 8 : i32
    %63 = arith.addi %48, %c8_i32_22 : i32
    %c8_i32_23 = arith.constant 8 : i32
    %64 = arith.cmpi eq, %63, %c8_i32_23 : i32
    %cst_24 = arith.constant 1.000000e+00 : f32
    %cst_25 = arith.constant 5.000000e-01 : f32
    %65 = arith.select %64, %cst_24, %cst_25 : f32
    %66 = vector.extract_strided_slice %4 {offsets = [6, 0, 0], sizes = [1, 16, 16], strides = [1, 1, 1]} : vector<8x16x16xf32> to vector<1x16x16xf32>
    %67 = vector.shape_cast %66 : vector<1x16x16xf32> to vector<16x16xf32>
    %68 = arith.subf %8, %67 : vector<16x16xf32>
    %69 = vector.broadcast %65 : f32 to vector<16x16xf32>
    %70 = arith.mulf %68, %69 : vector<16x16xf32>
    %71 = vector.extract_strided_slice %47 {offsets = [7, 0, 0], sizes = [1, 16, 16], strides = [1, 1, 1]} : vector<8x16x16xf32> to vector<1x16x16xf32>
    %72 = vector.shape_cast %71 : vector<1x16x16xf32> to vector<16x16xf32>
    %73 = arith.mulf %70, %70 : vector<16x16xf32>
    %74 = arith.addf %72, %73 : vector<16x16xf32>
    %cst_26 = arith.constant 9.99999993E-9 : f32
    %75 = vector.broadcast %cst_26 : f32 to vector<16x16xf32>
    %76 = arith.addf %74, %75 : vector<16x16xf32>
    %77 = math.sqrt %76 : vector<16x16xf32>
    %78 = arith.addf %62, %77 : vector<16x16xf32>
    %79 = vector.extract_strided_slice %4 {offsets = [2, 0, 0], sizes = [6, 16, 16], strides = [1, 1, 1]} : vector<8x16x16xf32> to vector<6x16x16xf32>
    %80 = vector.extract_strided_slice %4 {offsets = [0, 0, 0], sizes = [6, 16, 16], strides = [1, 1, 1]} : vector<8x16x16xf32> to vector<6x16x16xf32>
    %81 = arith.subf %79, %80 : vector<6x16x16xf32>
    %cst_27 = arith.constant 5.000000e-01 : f32
    %82 = vector.broadcast %cst_27 : f32 to vector<6x16x16xf32>
    %83 = arith.mulf %81, %82 : vector<6x16x16xf32>
    %84 = vector.extract_strided_slice %47 {offsets = [1, 0, 0], sizes = [6, 16, 16], strides = [1, 1, 1]} : vector<8x16x16xf32> to vector<6x16x16xf32>
    %85 = arith.mulf %83, %83 : vector<6x16x16xf32>
    %86 = arith.addf %84, %85 : vector<6x16x16xf32>
    %cst_28 = arith.constant 9.99999993E-9 : f32
    %87 = vector.broadcast %cst_28 : f32 to vector<6x16x16xf32>
    %88 = arith.addf %86, %87 : vector<6x16x16xf32>
    %89 = math.sqrt %88 : vector<6x16x16xf32>
    %cst_29 = arith.constant dense<0.000000e+00> : vector<16x16xf32>
    %90 = vector.multi_reduction <add>, %89, %cst_29 [0] : vector<6x16x16xf32> to vector<16x16xf32>
    %91 = arith.addf %78, %90 : vector<16x16xf32>
    %c0_30 = arith.constant 0 : index
    %c0_31 = arith.constant 0 : index
    %c0_32 = arith.constant 0 : index
    %92 = vector.load %arg5[%c0_30, %c0_31, %c0_32] : memref<1x16x16xf32, #tpu.memory_space<vmem>>, vector<1x16x16xf32>
    %93 = vector.shape_cast %92 : vector<1x16x16xf32> to vector<16x16xf32>
    %94 = arith.addf %93, %91 : vector<16x16xf32>
    %c0_33 = arith.constant 0 : index
    %c0_34 = arith.constant 0 : index
    %c0_35 = arith.constant 0 : index
    %95 = vector.load %arg5[%c0_33, %c0_34, %c0_35] : memref<1x16x16xf32, #tpu.memory_space<vmem>>, vector<1x16x16xf32>
    %96 = vector.shape_cast %95 : vector<1x16x16xf32> to vector<16x16xf32>
    %97 = vector.shape_cast %94 : vector<16x16xf32> to vector<1x16x16xf32>
    tpu.vector_store %arg5[%c0_33, %c0_34, %c0_35], %97 {strides = array<i32>} : memref<1x16x16xf32, #tpu.memory_space<vmem>>, vector<1x16x16xf32>,
    return
  }
  func.func @transform_0(%arg0: i32, %arg1: i32) -> (i32, i32, i32, i32) {
    %c0_i32 = arith.constant 0 : i32
    %c0_i32_0 = arith.constant 0 : i32
    %c0_i32_1 = arith.constant 0 : i32
    return %arg0, %arg1, %c0_i32, %c0_i32_0 : i32, i32, i32, i32
  }
  func.func @transform_1(%arg0: i32, %arg1: i32) -> (i32, i32, i32, i32) {
    %c8_i32 = arith.constant 8 : i32
    %0 = arith.muli %arg1, %c8_i32 : i32
    %c1_i32 = arith.constant 1 : i32
    %1 = arith.subi %0, %c1_i32 : i32
    %c0_i32 = arith.constant 0 : i32
    %2 = arith.maxsi %1, %c0_i32 : i32
    %c0_i32_0 = arith.constant 0 : i32
    %c0_i32_1 = arith.constant 0 : i32
    %c0_i32_2 = arith.constant 0 : i32
    return %arg0, %2, %c0_i32_0, %c0_i32_1 : i32, i32, i32, i32
  }
  func.func @transform_2(%arg0: i32, %arg1: i32) -> (i32, i32, i32, i32) {
    %c1_i32 = arith.constant 1 : i32
    %0 = arith.addi %arg1, %c1_i32 : i32
    %c8_i32 = arith.constant 8 : i32
    %1 = arith.muli %0, %c8_i32 : i32
    %c7_i32 = arith.constant 7 : i32
    %2 = arith.minsi %1, %c7_i32 : i32
    %c0_i32 = arith.constant 0 : i32
    %c0_i32_0 = arith.constant 0 : i32
    %c0_i32_1 = arith.constant 0 : i32
    return %arg0, %2, %c0_i32, %c0_i32_0 : i32, i32, i32, i32
  }
  func.func @transform_3(%arg0: i32, %arg1: i32) -> (i32, i32, i32) {
    %c0_i32 = arith.constant 0 : i32
    %c0_i32_0 = arith.constant 0 : i32
    %c0_i32_1 = arith.constant 0 : i32
    return %arg0, %c0_i32, %c0_i32_0 : i32, i32, i32
  }
}

</mosaic_0001>

<bundles_post_ra>
// kernel: tpu_custom_call.1
= control target key start
LH: loop header
LB: loop body
LE: loop exit
PB: predicated region body
PF: predicated region fallthrough
CT: control target
= control target key end

     0   :  { %s2343_s0 = inlined_call_operand.hbm [shape: f32[6,8,16,16], index: 0, kind: input, shape index: {}]   ;;  %s2344_s1 = inlined_call_operand.hbm [shape: f32[6,8,16,16], index: 1, kind: input, shape index: {}]   ;;  %s2345_s2 = inlined_call_operand.hbm [shape: f32[6,8,16,16], index: 2, kind: input, shape index: {}]   ;;  %s2346_s3 = inlined_call_operand.hbm [shape: f32[6,16,16], index: 3, kind: output, shape index: {}]  }
   0x1   :  { %2356 = sst [smem:[#allocation16_spill]] %s2344_s1 }
   0x2   :  { %8 = vsyncpa [#allocation3], 0 }
   0x3   :  { %10 = vsyncpa [#allocation3 + $0x1], 0 }
   0x4   :  { %11 = vsyncpa [#allocation6], 0 }
   0x5   :  { %13 = vsyncpa [#allocation6 + $0x1], 0 }
   0x6   :  { %14 = vsyncpa [#allocation4], 0 }
   0x7   :  { %16 = vsyncpa [#allocation4 + $0x1], 0  ;;  %s1455_s12 = smov 0   ;;  %s1457_s13 = smov 0  }
   0x8   :  { %s1459_s14 = smov 0   ;;  %s1461_s15 = smov 0  }
   0x9   :  { %s1463_s16 = smov 0   ;;  %s1465_s17 = smov 0  }
   0xa LB: > { %2357 = sst [smem:[#allocation12_spill]] %s1409_s14  ;;  %s1486_s18 = sadd.s32 4294967295, %s1421_s17   ;;  %s1421_s17 = sphi %s1465_s17, %s22_s17   ;;  %s1417_s16 = sphi %s1463_s16, %s2378_s16   ;;  %s1413_s15 = sphi %s1461_s15, %s2377_s15   ;;  %s1409_s14 = sphi %s1459_s14, %s2376_s14   ;;  %s1405_s13 = sphi %s1457_s13, %s2380_s13   ;;  %s1401_s12 = sphi %s1455_s12, %s2379_s12  }
   0xb   : > { %2358 = sst [smem:[#allocation13_spill]] %s1417_s16  ;;  %s1105_s19 = sadd.s32 4294967294, %s1421_s17  }
   0xc   : > { %s34_s20 = sadd.s32 1, %s1417_s16  ;;  %s43_s21 = sadd.s32 1, %s1409_s14 }
   0xd   : > { %p36_p0 = scmp.ge.s32.totalorder %s34_s20, 6  ;;  %p50_p1 = scmp.ne.s32.totalorder %s1409_s14, %s1405_s13 }
   0xe   : > { %p51_p2 = scmp.eq.s32.totalorder %s1421_s17, 0  ;;  %p56_p3 = scmp.ne.s32.totalorder %s1405_s13, %s1401_s12 }
   0xf   : > { %s2382_s20 = smov (%p36_p0, %s34_s20), 0  ;;  %p57_p5 = scmp.eq.s32.totalorder %s1486_s18, 0 }
  0x10   : > { %2359 = sst [smem:[#allocation14_spill]] %s2382_s20  ;;  %p1498_p4 = por %p51_p2, %p50_p1 }
  0x11   : > { %s38_s23 = ssub.s32 %s1417_s16, %s2382_s20  ;;  %p152_p6 = scmp.eq.s32.totalorder %s1486_s18, 5 }
  0x12   : > { %p41_p7 = scmp.eq.s32.totalorder %s38_s23, 0  ;;  %p1506_p8 = por %p57_p5, %p56_p3 }
  0x13   : > { %p1510_p9 = por %p152_p6, %p50_p1  ;;  %p158_p10 = scmp.eq.s32.totalorder %s1105_s19, 5 }
  0x14   : > { %s2361_s24 = scalar_select %p1506_p8, 1, 0 }
  0x15   : > { %s2362_s25 = scalar_select %p1510_p9, 1, 0 }
  0x16   : > { %s1515_s26 = scalar_select %p41_p7, %s1409_s14, %s43_s21  }
  0x17   : > { %p1517_p11 = por %p158_p10, %p56_p3  ;;  %p1155_p12 = scmp.lt.s32.totalorder %s1421_s17, 6 }
  0x18   : > { %2363 = sst [smem:[#allocation15_spill]] %s1515_s26  ;;  %s1523_s28 = sand.u32 1, %s1409_s14  }
  0x19   : > { %s2364_s27 = scalar_select %p1517_p11, 1, 0 }
  0x1a   : > { %s1526_s29 = sshll.u32 %s1417_s16, 11  ;;  %p1530_p13 = pnand %p1155_p12, %p1498_p4 }
  0x1b   : > { %s202_s4 = sand.u32 1, %s1421_s17   ;;  %s1111_s5 = sshll.u32 %s1523_s28, 4 }
  0x1c   : > { %s2366_s1 = sld [smem:[#allocation16_spill]]  ;;  %s206_s9 = scalar_lea.vmem [#allocation5], %s1111_s5 }
  0x1d   : > { %s219_s10 = sshll.u32 %s206_s9, 4  ;;  %s1544_s11 = scalar_lea.vmem [#allocation7], %s1111_s5  ;;  %s1542_s10 = int_to_ptr.vmem [resolvable:$true] %s219_s10 }
  0x1e   : > { %s246_s19 = sshll.u32 %s1544_s11, 4  ;;  %s1547_s21 = scalar_lea.sflag [#allocation6], %s202_s4  ;;  %s1582_s19 = int_to_ptr.vmem [resolvable:$true] %s246_s19 }
  0x1f   : > { %p1553_p1 = pneg %p1530_p13 }
  0x22   : > { %s1540_s8 = scalar_lea.hbm %s2366_s1, %s1526_s29  ;;  %s1250_s5 = scalar_lea.hbm %s2366_s1, 12288 }
  0x23   : > { %s1245_s22 = scalar_lea.hbm %s1540_s8, 256  ;;  %p1251_p4 = scmp.lt.u32.totalorder %s1540_s8, %s2366_s1 }
  0x24   : > { %p1246_p0 = scmp.ne.s32.totalorder %s1540_s8, %s1245_s22  ;;  %p1252_p5 = scmp.lt.u32.totalorder %s1250_s5, %s1245_s22 }
  0x25   : > { %p1254_p7 = scmp.lt.u32.totalorder %s1245_s22, %s1540_s8 }
  0x26   : > { %p1248_p2 = pnand %p1553_p1, %p1246_p0  ;;  %p1253_p6 = por %p1252_p5, %p1251_p4 }
  0x28   : > { %p1249_p3 = pneg %p1248_p2  ;;  %p1255_p10 = por %p1254_p7, %p1253_p6 }
  0x2a   : > { %p1256_p12 = pnand %p1255_p10, %p1249_p3 }
  0x2c   : > { %1259 = shalt.err (!%p1256_p12)
}
  0x2d   : > { %s1260_s4 = scalar_lea.vmem %s1542_s10, 256  ;;  %s1423_s6 = smov [#allocation5]  }
  0x2e   : > { %p1261_p0 = scmp.ne.s32.totalorder %s1542_s10, %s1260_s4  ;;  %s1265_s7 = sshll.u32 %s1423_s6, 4  ;;  %s1266_s7 = int_to_ptr.vmem [resolvable:$false] %s1265_s7 }
  0x2f   : > { %s1267_s20 = scalar_lea.vmem %s1266_s7, 512  ;;  %p1268_p9 = scmp.lt.s32.totalorder %s1542_s10, %s1266_s7 }
  0x30   : > { %p1263_p2 = pnand %p1261_p0, %p1553_p1  ;;  %p1269_p8 = scmp.lt.s32.totalorder %s1267_s20, %s1260_s4 }
  0x32   : > { %p1264_p11 = pneg %p1263_p2  ;;  %p1270_p4 = por %p1269_p8, %p1268_p9 }
  0x34   : > { %p1271_p5 = pnand %p1270_p4, %p1264_p11 }
  0x36   : > { %1274 = shalt.err (!%p1271_p5)
}
  0x37   : > { %s2350_s22 = smov 128   ;;  %s2352_s5 = smov 8  }
  0x38   : > { %1147 = dma.hbm_to_vmem [thread:$0]  (!%p1530_p13), %s1540_s8, 256, %s1542_s10, %s1547_s21, %s2350_s22, %s2350_s22, %s2352_s5  }
  0x39   : > { %p1117_p8 = scmp.ge.s32.totalorder %s1421_s17, 1  ;;  %p254_p9 = scmp.lt.s32.totalorder %s1421_s17, 7 }
  0x3a   : > { %s1108_s4 = sshll.u32 %s1523_s28, 7  ;;  %s1595_s20 = scalar_lea.hbm %s2343_s0, %s1526_s29 }
  0x3b   : > { %p1586_p11 = pnand %p1117_p8, %p254_p9  ;;  %s182_s8 = scalar_lea.vmem [#allocation2], %s1108_s4 }
  0x3c   : > { %s192_s10 = sshll.u32 %s182_s8, 4  ;;  %s1130_s11 = sadd.s32 1792, %s1526_s29  ;;  %s1598_s10 = int_to_ptr.vmem [resolvable:$true] %s192_s10 }
  0x3d   : > { %s2368_s9 = scalar_select %p1586_p11, 1, 0 }
  0x3e   : > { %s1603_s1 = scalar_lea.hbm %s2345_s2, %s1130_s11  ;;  %s179_s16 = scalar_lea.sflag [#allocation3], %s1523_s28 }
  0x3f   : > { %s1275_s26 = scalar_lea.hbm %s1595_s20, 2048  ;;  %s1280_s14 = scalar_lea.hbm %s2343_s0, 12288 }
  0x40   : > { %p1276_p3 = scmp.ne.s32.totalorder %s1595_s20, %s1275_s26  ;;  %p1281_p10 = scmp.lt.u32.totalorder %s1595_s20, %s2343_s0 }
  0x41   : > { %p1282_p12 = scmp.lt.u32.totalorder %s1280_s14, %s1275_s26  ;;  %p1284_p2 = scmp.lt.u32.totalorder %s1275_s26, %s1595_s20 }
  0x42   : > { %p1278_p6 = pnand %p1276_p3, %p1553_p1 }
  0x43   : > { %p1283_p0 = por %p1282_p12, %p1281_p10 }
  0x44   : > { %p1279_p7 = pneg %p1278_p6 }
  0x45   : > { %p1285_p4 = por %p1284_p2, %p1283_p0 }
  0x47   : > { %p1286_p5 = pnand %p1285_p4, %p1279_p7 }
  0x49   : > { %1289 = shalt.err (!%p1286_p5)
}
  0x4a   : > { %s1290_s29 = scalar_lea.vmem %s1598_s10, 2048  ;;  %s1426_s22 = smov [#allocation2]  }
  0x4b   : > { %p1291_p8 = scmp.ne.s32.totalorder %s1598_s10, %s1290_s29  ;;  %s1295_s5 = sshll.u32 %s1426_s22, 4  ;;  %s1296_s5 = int_to_ptr.vmem [resolvable:$false] %s1295_s5 }
  0x4c   : > { %s1297_s11 = scalar_lea.vmem %s1296_s5, 4096  ;;  %p1298_p6 = scmp.lt.s32.totalorder %s1598_s10, %s1296_s5 }
  0x4d   : > { %p1293_p9 = pnand %p1291_p8, %p1553_p1  ;;  %p1299_p11 = scmp.lt.s32.totalorder %s1297_s11, %s1290_s29 }
  0x4f   : > { %p1294_p3 = pneg %p1293_p9  ;;  %p1300_p10 = por %p1299_p11, %p1298_p6 }
  0x51   : > { %p1301_p12 = pnand %p1300_p10, %p1294_p3 }
  0x53   : > { %1304 = shalt.err (!%p1301_p12)
}
  0x54   : > { %s2369_s14 = smov 8   ;;  %s2370_s26 = smov 128  }
  0x55   : > { %1144 = dma.hbm_to_vmem [thread:$0]  (!%p1530_p13), %s1595_s20, 2048, %s1598_s10, %s179_s16, %s2370_s26, %s2370_s26, %s2369_s14  }
  0x56   : > { %s1305_s6 = scalar_lea.hbm %s1603_s1, 256  ;;  %s1310_s8 = scalar_lea.hbm %s2345_s2, 12288 }
  0x57   : > { %p1306_p7 = scmp.ne.s32.totalorder %s1603_s1, %s1305_s6  ;;  %p1311_p2 = scmp.lt.u32.totalorder %s1603_s1, %s2345_s2 }
  0x58   : > { %p1312_p4 = scmp.lt.u32.totalorder %s1310_s8, %s1305_s6  ;;  %p1314_p8 = scmp.lt.u32.totalorder %s1305_s6, %s1603_s1 }
  0x59   : > { %p1308_p11 = pnand %p1306_p7, %p1553_p1 }
  0x5a   : > { %p1313_p5 = por %p1312_p4, %p1311_p2 }
  0x5b   : > { %p1309_p0 = pneg %p1308_p11 }
  0x5c   : > { %p1315_p9 = por %p1314_p8, %p1313_p5 }
  0x5e   : > { %p1316_p3 = pnand %p1315_p9, %p1309_p0 }
  0x60   : > { %1319 = shalt.err (!%p1316_p3)
}
  0x61   : > { %s1320_s16 = scalar_lea.vmem %s1582_s19, 256  ;;  %s1427_s28 = smov [#allocation7]  }
  0x62   : > { %p1321_p6 = scmp.ne.s32.totalorder %s1582_s19, %s1320_s16  ;;  %s1325_s20 = sshll.u32 %s1427_s28, 4  ;;  %s1326_s20 = int_to_ptr.vmem [resolvable:$false] %s1325_s20 }
  0x63   : > { %s1327_s10 = scalar_lea.vmem %s1326_s20, 512  ;;  %p1328_p7 = scmp.lt.s32.totalorder %s1582_s19, %s1326_s20 }
  0x64   : > { %p1323_p10 = pnand %p1321_p6, %p1553_p1  ;;  %p1329_p11 = scmp.lt.s32.totalorder %s1327_s10, %s1320_s16 }
  0x66   : > { %p1324_p12 = pneg %p1323_p10  ;;  %p1330_p2 = por %p1329_p11, %p1328_p7 }
  0x68   : > { %p1331_p4 = pnand %p1330_p2, %p1324_p12 }
  0x6a   : > { %1334 = shalt.err (!%p1331_p4)
}
  0x6b   : > { %1150 = dma.hbm_to_vmem [thread:$0]  (!%p1530_p13), %s1603_s1, 256, %s1582_s19, %s1547_s21, %s2370_s26, %s2370_s26, %s2369_s14  }
  0x6c   : > { %p2371_p1 = scmp.ne.s32.totalorder %s2368_s9, 0 }
  0x6d   : > { %s1660_s23 = sand.u32 (!%p2371_p1), 1, %s1405_s13   ;;  %p2372_p0 = scmp.ne.s32.totalorder (!%p2371_p1), %s2361_s24, 0 }
  0x6e   : > { %258 = sbr.rel (%p2371_p1) target bundleno = 348 (0x15c), region = 32  ;;  %s1118_s5 = sshll.u32 (!%p2371_p1), %s1660_s23, 7 }
  0x6f   : > { %s261_s11 = scalar_lea.sflag (!%p2371_p1), [#allocation3], %s1660_s23  ;;  %s1664_s6 = scalar_lea.vmem (!%p2371_p1), [#allocation2], %s1118_s5 }
  0x75   : > { %1388 = dma.done.wait (%p2372_p0), %s261_s11, 2048  }
  0x76   : > { %1390 = vsyncadd (%p2372_p0), %s261_s11, 4294965248  ;;  %s269_s1 = sand.u32 1, %s1486_s18   ;;  %s1672_s30 = sshll.u32 %s1660_s23, 4 }
  0x77   : > { %s270_s19 = scalar_lea.sflag [#allocation6], %s269_s1  ;;  %s273_s21 = scalar_lea.vmem [#allocation5], %s1672_s30 }
  0x78   : > { %1392 = dma.done.wait (%p2372_p0), %s270_s19, 512  }
  0x79   : > { %1394 = vsyncadd (%p2372_p0), %s270_s19, 4294966784  ;;  %v1680_v0 = vld [vmem:[%s1664_s6 + $0x20] sm:$0xff]  ;;  %v1683_v1 = vld [vmem:[%s1664_s6 + $0x10] sm:$0xff]  ;;  %s1428_s18 = smov 127   ;;  %s1429_s24 = smov 1   ;;  %vm328_vm0 = vcmask 130048   ;;  %v481_v17 = vlaneseq }
  0x7a   : > { %516 = vrot.lane.b32.xlu1 %v1680_v0, %s1428_s18  ;;  %512 = vrot.lane.b32.xlu0 %v1683_v1, %s1428_s18  ;;  %v1690_v2 = vld [vmem:[%s1664_s6 + $0x28] sm:$0xff]  ;;  %v1693_v3 = vld [vmem:[%s1664_s6 + $0x18] sm:$0xff]  ;;  %s1792_s9 = scalar_lea.vmem [#allocation8], %s1672_s30  ;;  %v1430_v16 = vmov 0.0   ;;  %v420_v21 = vrot.slane %v1683_v1, 7  ;;  %vm367_vm1 = vcmask 1046528  }
  0x7b   : > { %v1708_v4 = vld [vmem:[%s1664_s6 + $0x38] sm:$0xff]  ;;  %v1711_v5 = vld [vmem:[%s1664_s6 + $0x30] sm:$0xff]  ;;  %v1722_v6 = vld [vmem:[%s1664_s6 + $0x48] sm:$0xff]  ;;  %329 = vst.msk [vmem:[%s1792_s9] sm:$0xff] %vm328_vm0, %v1430_v16  ;;  %v482_v18 = vshrl.u32 %v481_v17, 7  ;;  %v655_v19 = vand.u32 127, %v481_v17 }
  0x7c   : > { %v1725_v7 = vld [vmem:[%s1664_s6 + $0x40] sm:$0xff]  ;;  %v1736_v8 = vld [vmem:[%s1664_s6 + $0x58] sm:$0xff]  ;;  %v1739_v9 = vld [vmem:[%s1664_s6 + $0x50] sm:$0xff]  ;;  %330 = vst.msk [vmem:[%s1792_s9 + $0x8] sm:$0xff] %vm328_vm0, %v1430_v16  ;;  %v372_v20 = vrot.slane %v1693_v3, 1  ;;  %v421_v22 = vrot.slane %v1693_v3, 7  ;;  %v785_v55 = vsub.f32 %v1708_v4, %v1693_v3  ;;  %v784_v58 = vsub.f32 %v1711_v5, %v1683_v1 }
  0x7d   : > { %v1750_v10 = vld [vmem:[%s1664_s6 + $0x68] sm:$0xff]  ;;  %v1753_v11 = vld [vmem:[%s1664_s6 + $0x60] sm:$0xff]  ;;  %v1774_v14 = vld [vmem:[%s1664_s6 + $0x78] sm:$0xff]  ;;  %vm416_vm2 = vcmask 1040384   ;;  %v483_v23 = vadd.s32 8, %v482_v18  ;;  %v371_v24 = vrot.slane %v1683_v1, 1  ;;  %v787_v60 = vsub.f32 %v1722_v6, %v1690_v2 }
  0x7e   : > { %518 = vrot.lane.b32.xlu1 %v1690_v2, %s1428_s18  ;;  %514 = vrot.lane.b32.xlu0 %v1693_v3, %s1428_s18  ;;  %v1764_v12 = vld [vmem:[%s1664_s6 + $0x8] sm:$0xff]  ;;  %v1767_v13 = vld [vmem:[%s1664_s6] sm:$0xff]  ;;  %vm656_vm3 = vcmp.eq.s32.totalorder %v655_v19, 0  ;;  %v375_v25 = vrot.slane %v1690_v2, 1  ;;  %v423_v26 = vrot.slane %v1680_v0, 7  ;;  %v424_v27 = vrot.slane %v1690_v2, 7 }
  0x7f   : > { %v1777_v15 = vld [vmem:[%s1664_s6 + $0x70] sm:$0xff]  ;;  %vm657_vm4 = vcmp.eq.s32.totalorder %v655_v19, 15  ;;  %v409_v28 = vsel %vm367_vm1, %v372_v20, %v1693_v3  ;;  %v422_v29 = vsel %vm416_vm2, %v420_v21, %v421_v22  ;;  %v374_v30 = vrot.slane %v1680_v0, 1  ;;  %s282_s14 = scalar_lea.vmem [#allocation7], %s1672_s30  ;;  %s1131_s26 = sshll.u32 %s1413_s15, 8 }
  0x80   : > { %vm487_vm5 = vcmp.eq.s32.totalorder %v483_v23, 15  ;;  %v378_v31 = vrot.slane %v1708_v4, 1  ;;  %v426_v32 = vrot.slane %v1711_v5, 7  ;;  %v427_v33 = vrot.slane %v1708_v4, 7  ;;  %vm658_vm7 = vmor %vm656_vm3, %vm657_vm4  ;;  %s971_s7 = sshll.u32 %s1792_s9, 4  ;;  %s2289_s29 = scalar_lea.hbm %s2346_s3, %s1131_s26  ;;  %s2291_s7 = int_to_ptr.vmem [resolvable:$true] %s971_s7 }
  0x81   : > { %vm484_vm6 = vcmp.eq.s32.totalorder %v482_v18, 0  ;;  %v373_v34 = vsel %vm367_vm1, %v371_v24, %v372_v20  ;;  %v458_v35 = vsel %vm416_vm2, %v1683_v1, %v420_v21  ;;  %v377_v36 = vrot.slane %v1711_v5, 1  ;;  %s958_s15 = scalar_lea.sflag [#allocation4], %s1660_s23  ;;  %s1335_s22 = scalar_lea.vmem %s2291_s7, 256 }
  0x82   : > { %579 = vrot.lane.b32.xlu1 %v1693_v3, %s1429_s24  ;;  %577 = vrot.lane.b32.xlu0 %v1683_v1, %s1429_s24  ;;  %v468_v37 = vsub.f32 %v409_v28, %v422_v29  ;;  %v783_v38 = vsub.f32 %v1690_v2, %v1764_v12  ;;  %v410_v39 = vsel %vm367_vm1, %v375_v25, %v1690_v2  ;;  %v1431_v41 = vmov 0.5   ;;  %p1336_p13 = scmp.ne.s32.totalorder %s2291_s7, %s1335_s22  ;;  %p2373_p5 = scmp.ne.s32.totalorder %s2362_s25, 0 }
  0x83   : > { %v425_v40 = vsel %vm416_vm2, %v423_v26, %v424_v27  ;;  %v1821_v42 = vsel %vm487_vm5, 1.0, %v1431_v41  ;;  %v376_v43 = vsel %vm367_vm1, %v374_v30, %v375_v25  ;;  %v459_v44 = vsel %vm416_vm2, %v1680_v0, %v423_v26  ;;  %s1432_s16 = smov [#allocation8]  }
  0x84   : > { %v1828_v45 = vsel %vm484_vm6, 1.0, %v1431_v41  ;;  %v467_v46 = vsub.f32 %v373_v34, %v458_v35  ;;  %v411_v47 = vsel %vm367_vm1, %v378_v31, %v1708_v4  ;;  %v428_v48 = vsel %vm416_vm2, %v426_v32, %v427_v33  ;;  %p1337_p8 = pnand %p1336_p13, %p2373_p5  ;;  %s1339_s28 = sshll.u32 %s1432_s16, 4  ;;  %s1340_s28 = int_to_ptr.vmem [resolvable:$false] %s1339_s28 }
  0x85   : > { %v782_v49 = vsub.f32 %v1680_v0, %v1767_v13  ;;  %v470_v50 = vsub.f32 %v410_v39, %v425_v40  ;;  %v379_v51 = vsel %vm367_vm1, %v377_v36, %v378_v31  ;;  %v460_v52 = vsel %vm416_vm2, %v1711_v5, %v426_v32  ;;  %s1341_s20 = scalar_lea.vmem %s1340_s28, 512  ;;  %p1342_p3 = scmp.lt.s32.totalorder %s2291_s7, %s1340_s28 }
  0x86   : > { %583 = vrot.lane.b32.xlu1 %v1690_v2, %s1429_s24  ;;  %581 = vrot.lane.b32.xlu0 %v1680_v0, %s1429_s24  ;;  %v495_v53 = vmul.f32 %v1821_v42, %v468_v37  ;;  %v795_v54 = vmul.f32 0.5, %v783_v38  ;;  %v469_v56 = vsub.f32 %v376_v43, %v459_v44  ;;  %vm556_vm8 = vcmask 121856   ;;  %p1338_p9 = pneg %p1337_p8  ;;  %p1343_p6 = scmp.lt.s32.totalorder %s1341_s20, %s1335_s22 }
  0x87   : > { %vm621_vm9 = vcmask 7168   ;;  %v1841_v57 = vsel %vm658_vm7, 1.0, %v1431_v41  ;;  %v472_v59 = vsub.f32 %v411_v47, %v428_v48  ;;  %v471_v61 = vsub.f32 %v379_v51, %v460_v52 }
  0x88   : > { %v381_v62 = vrot.slane %v1722_v6, 1  ;;  %v429_v63 = vrot.slane %v1725_v7, 7  ;;  %v430_v16 = vrot.slane %v1722_v6, 7  ;;  %v494_v19 = vmul.f32 %v1828_v45, %v467_v46  ;;  %p1344_p10 = por %p1343_p6, %p1342_p3 }
  0x89   : > { %v794_v20 = vmul.f32 0.5, %v782_v49  ;;  %v497_v21 = vmul.f32 %v1821_v42, %v470_v50  ;;  %v380_v22 = vrot.slane %v1725_v7, 1  ;;  %v1855_v23 = vmul.f32 %v495_v53, %v495_v53 }
  0x8a   : > { %522 = vrot.lane.b32.xlu1 %v1708_v4, %s1428_s18  ;;  %520 = vrot.lane.b32.xlu0 %v1711_v5, %s1428_s18  ;;  %v1857_v24 = vmul.f32 %v795_v54, %v795_v54  ;;  %v797_v25 = vmul.f32 0.5, %v785_v55  ;;  %v496_v26 = vmul.f32 %v1828_v45, %v469_v56  ;;  %v796_v27 = vmul.f32 0.5, %v784_v58  ;;  %p1345_p12 = pnand %p1344_p10, %p1338_p9 }
  0x8b   : > { %v499_v28 = vmul.f32 %v1821_v42, %v472_v59  ;;  %v799_v29 = vmul.f32 0.5, %v787_v60  ;;  %v786_v30 = vsub.f32 %v1725_v7, %v1680_v0  ;;  %v498_v31 = vmul.f32 %v1828_v45, %v471_v61 }
  0x8c   : > { %v412_v32 = vsel %vm367_vm1, %v381_v62, %v1722_v6  ;;  %v431_v33 = vsel %vm416_vm2, %v429_v63, %v430_v16  ;;  %v461_v34 = vsel %vm416_vm2, %v1725_v7, %v429_v63  ;;  %v382_v37 = vsel %vm367_vm1, %v380_v22, %v381_v62 }
  0x8d   : > { %v384_v38 = vrot.slane %v1736_v8, 1  ;;  %v432_v39 = vrot.slane %v1739_v9, 7  ;;  %v433_v40 = vrot.slane %v1736_v8, 7  ;;  %v1873_v41 = vmul.f32 %v494_v19, %v494_v19 }
  0x8e   : > { %587 = vrot.lane.b32.xlu1 %v1708_v4, %s1429_s24  ;;  %585 = vrot.lane.b32.xlu0 %v1711_v5, %s1429_s24  ;;  %v1875_v43 = vmul.f32 %v794_v20, %v794_v20  ;;  %v1877_v44 = vmul.f32 %v497_v21, %v497_v21  ;;  %v1879_v46 = vmul.f32 %v797_v25, %v797_v25  ;;  %v798_v49 = vmul.f32 0.5, %v786_v30 }
  0x8f   : > { %v1881_v47 = vmul.f32 %v496_v26, %v496_v26  ;;  %v1883_v48 = vmul.f32 %v796_v27, %v796_v27  ;;  %v474_v50 = vsub.f32 %v412_v32, %v431_v33  ;;  %v1885_v51 = vmul.f32 %v499_v28, %v499_v28 }
  0x90   : > { %v1887_v52 = vmul.f32 %v799_v29, %v799_v29  ;;  %v473_v53 = vsub.f32 %v382_v37, %v461_v34  ;;  %v383_v54 = vrot.slane %v1739_v9, 1  ;;  %v1890_v58 = vmul.f32 %v498_v31, %v498_v31 }
  0x91   : > { %v789_v59 = vsub.f32 %v1736_v8, %v1708_v4  ;;  %v413_v60 = vsel %vm367_vm1, %v384_v38, %v1736_v8  ;;  %v434_v61 = vsel %vm416_vm2, %v432_v39, %v433_v40  ;;  %v1905_v22 = vmul.f32 %v798_v49, %v798_v49 }
  0x92   : > { %526 = vrot.lane.b32.xlu1 %v1722_v6, %s1428_s18  ;;  %524 = vrot.lane.b32.xlu0 %v1725_v7, %s1428_s18  ;;  %v501_v25 = vmul.f32 %v1821_v42, %v474_v50  ;;  %v500_v26 = vmul.f32 %v1828_v45, %v473_v53  ;;  %v385_v27 = vsel %vm367_vm1, %v383_v54, %v384_v38  ;;  %v387_v37 = vrot.slane %v1750_v10, 1 }
  0x93   : > { %v462_v28 = vsel %vm416_vm2, %v1739_v9, %v432_v39  ;;  %v801_v33 = vmul.f32 0.5, %v789_v59  ;;  %v476_v34 = vsub.f32 %v413_v60, %v434_v61  ;;  %v435_v40 = vrot.slane %v1753_v11, 7 }
  0x94   : > { %v436_v38 = vrot.slane %v1750_v10, 7  ;;  %v1921_v49 = vmul.f32 %v501_v25, %v501_v25  ;;  %v791_v39 = vsub.f32 %v1750_v10, %v1722_v6  ;;  %v475_v50 = vsub.f32 %v385_v27, %v462_v28 }
  0x95   : > { %v790_v53 = vsub.f32 %v1753_v11, %v1725_v7 }
  0x96   : > { %591 = vrot.lane.b32.xlu1 %v1722_v6, %s1429_s24  ;;  %589 = vrot.lane.b32.xlu0 %v1725_v7, %s1429_s24 }
  0x97   : > { %v802_v27 = vmul.f32 0.5, %v790_v53 }
  0x9a   : > { %530 = vrot.lane.b32.xlu1 %v1736_v8, %s1428_s18  ;;  %528 = vrot.lane.b32.xlu0 %v1739_v9, %s1428_s18 }
  0x9e   : > { %595 = vrot.lane.b32.xlu1 %v1736_v8, %s1429_s24  ;;  %593 = vrot.lane.b32.xlu0 %v1739_v9, %s1429_s24 }
  0xa2   : > { %534 = vrot.lane.b32.xlu1 %v1750_v10, %s1428_s18  ;;  %532 = vrot.lane.b32.xlu0 %v1753_v11, %s1428_s18 }
  0xa6   : > { %599 = vrot.lane.b32.xlu1 %v1750_v10, %s1429_s24  ;;  %597 = vrot.lane.b32.xlu0 %v1753_v11, %s1429_s24 }
  0xaa   : > { %510 = vrot.lane.b32.xlu1 %v1764_v12, %s1428_s18  ;;  %508 = vrot.lane.b32.xlu0 %v1767_v13, %s1428_s18 }
  0xae   : > { %538 = vrot.lane.b32.xlu1 %v1774_v14, %s1428_s18  ;;  %536 = vrot.lane.b32.xlu0 %v1777_v15, %s1428_s18 }
  0xb2   : > { %575 = vrot.lane.b32.xlu1 %v1764_v12, %s1429_s24  ;;  %573 = vrot.lane.b32.xlu0 %v1767_v13, %s1429_s24 }
  0xb6   : > { %603 = vrot.lane.b32.xlu1 %v1774_v14, %s1429_s24  ;;  %601 = vrot.lane.b32.xlu0 %v1777_v15, %s1429_s24 }
  0xec   : > { %v1850_v17 = vpop.permute.xlu1 %516  ;;  %v513_v18 = vpop.permute.xlu0 %512 }
  0xed   : > { %v559_v62 = vsel %vm556_vm8, %v513_v18, %v1683_v1  ;;  %v788_v18 = vsub.f32 %v1739_v9, %v1711_v5  ;;  %v561_v25 = vsel %vm556_vm8, %v1850_v17, %v1680_v0 }
  0xef   : > { %v800_v59 = vmul.f32 0.5, %v788_v18  ;;  %v502_v18 = vmul.f32 %v1828_v45, %v475_v50  ;;  %v418_v50 = vrot.slane %v1764_v12, 7 }
  0xf0   : > { %v519_v35 = vpop.permute.xlu1 %518  ;;  %v515_v36 = vpop.permute.xlu0 %514 }
  0xf1   : > { %v560_v63 = vsel %vm556_vm8, %v515_v36, %v1693_v3  ;;  %v562_v54 = vsel %vm556_vm8, %v519_v35, %v1690_v2  ;;  %v437_v35 = vsel %vm416_vm2, %v435_v40, %v436_v38 }
  0xf4   : > { %v580_v55 = vpop.permute.xlu1 %579  ;;  %v578_v56 = vpop.permute.xlu0 %577 }
  0xf5   : > { %v625_v16 = vsel %vm621_vm9, %v1693_v3, %v580_v55  ;;  %v624_v19 = vsel %vm621_vm9, %v1683_v1, %v578_v56  ;;  %v1929_v56 = vmul.f32 %v500_v26, %v500_v26  ;;  %v803_v26 = vmul.f32 0.5, %v791_v39 }
  0xf6   : > { %v641_v20 = vsub.f32 %v560_v63, %v625_v16  ;;  %v640_v21 = vsub.f32 %v559_v62, %v624_v19  ;;  %v386_v19 = vrot.slane %v1753_v11, 1  ;;  %v369_v39 = vrot.slane %v1764_v12, 1 }
  0xf7   : > { %v1957_v53 = vmul.f32 %v803_v26, %v803_v26 }
  0xf8   : > { %v663_v29 = vmul.f32 %v1841_v57, %v641_v20  ;;  %v662_v30 = vmul.f32 %v1841_v57, %v640_v21  ;;  %v584_v31 = vpop.permute.xlu1 %583  ;;  %v582_v32 = vpop.permute.xlu0 %581  ;;  %v1934_v20 = vmul.f32 %v801_v33, %v801_v33  ;;  %v503_v21 = vmul.f32 %v1821_v42, %v476_v34 }
  0xf9   : > { %v627_v36 = vsel %vm621_vm9, %v1690_v2, %v584_v31  ;;  %v626_v62 = vsel %vm621_vm9, %v1680_v0, %v582_v32  ;;  %v414_v2 = vsel %vm367_vm1, %v387_v37, %v1750_v10  ;;  %v463_v31 = vsel %vm416_vm2, %v1753_v11, %v435_v40 }
  0xfa   : > { %v695_v55 = vmul.f32 %v663_v29, %v663_v29  ;;  %v694_v60 = vmul.f32 %v662_v30, %v662_v30  ;;  %v643_v61 = vsub.f32 %v562_v54, %v627_v36  ;;  %v642_v29 = vsub.f32 %v561_v25, %v626_v62 }
  0xfb   : > { %v1945_v30 = vmul.f32 %v800_v59, %v800_v59  ;;  %v478_v38 = vsub.f32 %v414_v2, %v437_v35  ;;  %v388_v0 = vsel %vm367_vm1, %v386_v19, %v387_v37  ;;  %v1952_v17 = vmul.f32 %v503_v21, %v503_v21 }
  0xfc   : > { %v523_v63 = vpop.permute.xlu1 %522  ;;  %v521_v16 = vpop.permute.xlu0 %520  ;;  %v711_v28 = vadd.f32 %v695_v55, %v1855_v23  ;;  %v710_v32 = vadd.f32 %v694_v60, %v1873_v41  ;;  %v665_v33 = vmul.f32 %v1841_v57, %v643_v61  ;;  %v417_v23 = vrot.slane %v1767_v13, 7 }
  0xfd   : > { %v1959_v40 = vmul.f32 %v502_v18, %v502_v18  ;;  %v1961_v41 = vmul.f32 %v802_v27, %v802_v27  ;;  %v368_v54 = vrot.slane %v1767_v13, 1  ;;  %v664_v37 = vmul.f32 %v1841_v57, %v642_v29 }
  0xfe   : > { %v819_v55 = vadd.f32 %v1857_v24, %v711_v28  ;;  %v477_v60 = vsub.f32 %v388_v0, %v463_v31  ;;  %v818_v61 = vadd.f32 %v1875_v43, %v710_v32  ;;  %v697_v62 = vmul.f32 %v665_v33, %v665_v33 }
  0xff   : > { %v505_v2 = vmul.f32 %v1821_v42, %v478_v38  ;;  %v793_v35 = vsub.f32 %v1774_v14, %v1736_v8  ;;  %v564_v25 = vsel %vm556_vm8, %v523_v63, %v1708_v4  ;;  %v792_v24 = vsub.f32 %v1777_v15, %v1739_v9 }
 0x100   : > { %v588_v34 = vpop.permute.xlu1 %587  ;;  %v586_v36 = vpop.permute.xlu0 %585  ;;  %v408_v26 = vsel %vm367_vm1, %v369_v39, %v1764_v12  ;;  %v419_v18 = vsel %vm416_vm2, %v417_v23, %v418_v50  ;;  %v370_v28 = vsel %vm367_vm1, %v368_v54, %v369_v39  ;;  %v457_v29 = vsel %vm416_vm2, %v1767_v13, %v417_v23 }
 0x101   : > { %v629_v59 = vsel %vm621_vm9, %v1708_v4, %v588_v34  ;;  %v628_v27 = vsel %vm621_vm9, %v1711_v5, %v586_v36  ;;  %v1984_v31 = vadd.f32 1e-08, %v819_v55  ;;  %v696_v4 = vmul.f32 %v664_v37, %v664_v37 }
 0x102   : > { %v645_v43 = vsub.f32 %v564_v25, %v629_v59  ;;  %v390_v63 = vrot.slane %v1774_v14, 1  ;;  %v438_v32 = vrot.slane %v1777_v15, 7  ;;  %v1988_v33 = vadd.f32 1e-08, %v818_v61 }
 0x103   : > { %v713_v34 = vadd.f32 %v697_v62, %v1877_v44  ;;  %v563_v38 = vsel %vm556_vm8, %v521_v16, %v1711_v5  ;;  %v439_v39 = vrot.slane %v1774_v14, 7  ;;  %v805_v23 = vmul.f32 0.5, %v793_v35 }
 0x104   : > { %v527_v19 = vpop.permute.xlu1 %526  ;;  %v525_v21 = vpop.permute.xlu0 %524  ;;  %v644_v50 = vsub.f32 %v563_v38, %v628_v27  ;;  %v504_v54 = vmul.f32 %v1828_v45, %v477_v60  ;;  %v389_v55 = vrot.slane %v1777_v15, 1  ;;  %v667_v37 = vmul.f32 %v1841_v57, %v645_v43 }
 0x105   : > { %v804_v59 = vmul.f32 0.5, %v792_v24  ;;  %v466_v61 = vsub.f32 %v408_v26, %v419_v18  ;;  %v465_v25 = vsub.f32 %v370_v28, %v457_v29  ;;  %1213 = vrsqrt.f32 %v1984_v31 }
 0x106   : > { %v712_v44 = vadd.f32 %v696_v4, %v1881_v47  ;;  %v415_v16 = vsel %vm367_vm1, %v390_v63, %v1774_v14  ;;  %1215 = vrsqrt.f32 %v1988_v33  ;;  %v821_v60 = vadd.f32 %v1879_v46, %v713_v34  ;;  %v348_v4 = vld [vmem:[%s273_s21 + $0x8] sm:$0xff] }
 0x107   : > { %v440_v26 = vsel %vm416_vm2, %v438_v32, %v439_v39  ;;  %v666_v47 = vmul.f32 %v1841_v57, %v644_v50  ;;  %v566_v18 = vsel %vm556_vm8, %v527_v19, %v1722_v6  ;;  %v391_v43 = vsel %vm367_vm1, %v389_v55, %v390_v63 }
 0x108   : > { %v592_v36 = vpop.permute.xlu1 %591  ;;  %v590_v0 = vpop.permute.xlu0 %589  ;;  %v464_v27 = vsel %vm416_vm2, %v1777_v15, %v438_v32  ;;  %v699_v28 = vmul.f32 %v667_v37, %v667_v37  ;;  %v565_v46 = vsel %vm556_vm8, %v525_v21, %v1725_v7  ;;  %v493_v34 = vmul.f32 %v1821_v42, %v466_v61 }
 0x109   : > { %v631_v5 = vsel %vm621_vm9, %v1722_v6, %v592_v36  ;;  %v630_v62 = vsel %vm621_vm9, %v1725_v7, %v590_v0  ;;  %v820_v38 = vadd.f32 %v1883_v48, %v712_v44  ;;  %v347_v6 = vld [vmem:[%s273_s21] sm:$0xff]  ;;  %v492_v19 = vmul.f32 %v1828_v45, %v465_v25  ;;  %v350_v44 = vld [vmem:[%s282_s14 + $0x8] sm:$0xff] }
 0x10a   : > { %v647_v29 = vsub.f32 %v566_v18, %v631_v5  ;;  %v646_v36 = vsub.f32 %v565_v46, %v630_v62  ;;  %v480_v63 = vsub.f32 %v415_v16, %v440_v26  ;;  %v2023_v0 = vadd.f32 1e-08, %v821_v60  ;;  %v349_v25 = vld [vmem:[%s282_s14] sm:$0xff] }
 0x10b   : > { %v2025_v50 = vmul.f32 %v505_v2, %v505_v2  ;;  %v2027_v7 = vmul.f32 %v504_v54, %v504_v54  ;;  %v479_v21 = vsub.f32 %v391_v43, %v464_v27  ;;  %v698_v55 = vmul.f32 %v666_v47, %v666_v47 }
 0x10c   : > { %v531_v35 = vpop.permute.xlu1 %530  ;;  %v529_v24 = vpop.permute.xlu0 %528  ;;  %v2029_v37 = vmul.f32 %v805_v23, %v805_v23  ;;  %v2031_v61 = vmul.f32 %v804_v59, %v804_v59  ;;  %v728_v48 = vsub.f32 %v1693_v3, %v348_v4  ;;  %v715_v5 = vadd.f32 %v699_v28, %v1885_v51 }
 0x10d   : > { %v669_v16 = vmul.f32 %v1841_v57, %v647_v29  ;;  %v2037_v60 = vmul.f32 %v493_v34, %v493_v34  ;;  %v727_v2 = vsub.f32 %v1683_v1, %v347_v6  ;;  %v2040_v54 = vadd.f32 1e-08, %v820_v38 }
 0x10e   : > { %v668_v23 = vmul.f32 %v1841_v57, %v646_v36  ;;  %v2043_v62 = vmul.f32 %v492_v19, %v492_v19  ;;  %v507_v59 = vmul.f32 %v1821_v42, %v480_v63  ;;  %1217 = vrsqrt.f32 %v2023_v0 }
 0x10f   : > { %v756_v51 = vsub.f32 %v350_v44, %v1750_v10  ;;  %v506_v47 = vmul.f32 %v1828_v45, %v479_v21  ;;  %v755_v18 = vsub.f32 %v349_v25, %v1753_v11  ;;  %v1214_v43 = vpop.eup %1213  ;;  %v714_v1 = vadd.f32 %v698_v55, %v1890_v58 }
 0x110   : > { %v596_v32 = vpop.permute.xlu1 %595  ;;  %v594_v39 = vpop.permute.xlu0 %593  ;;  %v568_v27 = vsel %vm556_vm8, %v531_v35, %v1736_v8  ;;  %v823_v29 = vadd.f32 %v1887_v52, %v715_v5  ;;  %v701_v4 = vmul.f32 %v669_v16, %v669_v16  ;;  %v567_v45 = vsel %vm556_vm8, %v529_v24, %v1739_v9 }
 0x111   : > { %v633_v28 = vsel %vm621_vm9, %v1736_v8, %v596_v32  ;;  %v632_v42 = vsel %vm621_vm9, %v1739_v9, %v594_v39  ;;  %v1216_v46 = vpop.eup %1215  ;;  %1219 = vrsqrt.f32 %v2040_v54  ;;  %v700_v58 = vmul.f32 %v668_v23, %v668_v23 }
 0x112   : > { %v649_v34 = vsub.f32 %v568_v27, %v633_v28  ;;  %v648_v38 = vsub.f32 %v567_v45, %v632_v42  ;;  %v2061_v36 = vmul.f32 %v728_v48, %v728_v48  ;;  %v2063_v8 = vmul.f32 %v727_v2, %v727_v2 }
 0x113   : > { %v2065_v19 = vmul.f32 %v507_v59, %v507_v59  ;;  %v2067_v63 = vmul.f32 %v756_v51, %v756_v51  ;;  %v2069_v52 = vmul.f32 %v506_v47, %v506_v47  ;;  %v850_v32 = vmul.f32 %v1214_v43, %v1984_v31 }
 0x114   : > { %v535_v3 = vpop.permute.xlu1 %534  ;;  %v533_v26 = vpop.permute.xlu0 %532  ;;  %vm851_vm10 = vcmp.eq.f32.partialorder %v1984_v31, inf  ;;  %v843_v9 = vmul.f32 %v1216_v46, %v1988_v33  ;;  %v2074_v24 = vmul.f32 %v755_v18, %v755_v18  ;;  %v2076_v39 = vadd.f32 1e-08, %v823_v29 }
 0x115   : > { %v822_v21 = vadd.f32 %v1905_v22, %v714_v1  ;;  %v717_v55 = vadd.f32 %v701_v4, %v1921_v49  ;;  %v671_v48 = vmul.f32 %v1841_v57, %v649_v34  ;;  %v716_v44 = vadd.f32 %v700_v58, %v1929_v56 }
 0x116   : > { %v670_v25 = vmul.f32 %v1841_v57, %v648_v38  ;;  %v570_v5 = vsel %vm556_vm8, %v535_v3, %v1750_v10  ;;  %v569_v23 = vsel %vm556_vm8, %v533_v26, %v1753_v11  ;;  %v854_v56 = vand.u32 2147483648, %v1984_v31 }
 0x117   : > { %v703_v2 = vmul.f32 %v671_v48, %v671_v48  ;;  %vm844_vm11 = vcmp.eq.f32.partialorder %v1988_v33, inf  ;;  %1221 = vrsqrt.f32 %v2076_v39  ;;  %v824_v1 = vadd.f32 %v1945_v30, %v716_v44 }
 0x118   : > { %v600_v35 = vpop.permute.xlu1 %599  ;;  %v598_v6 = vpop.permute.xlu0 %597  ;;  %v702_v47 = vmul.f32 %v670_v25, %v670_v25  ;;  %v845_v42 = vsel %vm844_vm11, %v1988_v33, %v843_v9  ;;  %v2106_v46 = vadd.f32 1e-08, %v822_v21  ;;  %v847_v34 = vand.u32 2147483648, %v1988_v33 }
 0x119   : > { %v635_v16 = vsel %vm621_vm9, %v1750_v10, %v600_v35  ;;  %v634_v22 = vsel %vm621_vm9, %v1753_v11, %v598_v6  ;;  %v1218_v18 = vpop.eup %1217  ;;  %v825_v10 = vadd.f32 %v1934_v20, %v717_v55  ;;  %v719_v26 = vadd.f32 %v703_v2, %v1952_v17 }
 0x11a   : > { %v651_v59 = vsub.f32 %v570_v5, %v635_v16  ;;  %v650_v3 = vsub.f32 %v569_v23, %v634_v22  ;;  %v852_v11 = vsel %vm851_vm10, %v1984_v31, %v850_v32  ;;  %v718_v27 = vadd.f32 %v702_v47, %v1959_v40 }
 0x11b   : > { %v827_v20 = vadd.f32 %v1957_v53, %v719_v26  ;;  %v1220_v45 = vpop.eup %1219  ;;  %v864_v58 = vmul.f32 %v1218_v18, %v2023_v0  ;;  %vm853_vm12 = vcmp.eq.f32.partialorder %v1984_v31, 0.0  ;;  %vm846_vm13 = vcmp.eq.f32.partialorder %v1988_v33, 0.0 }
 0x11c   : > { %v511_v49 = vpop.permute.xlu1 %510  ;;  %v2091_v51 = vpop.permute.xlu0 %508  ;;  %v673_v43 = vmul.f32 %v1841_v57, %v651_v59  ;;  %v672_v28 = vmul.f32 %v1841_v57, %v650_v3  ;;  %v826_v30 = vadd.f32 %v1961_v41, %v718_v27  ;;  %vm865_vm14 = vcmp.eq.f32.partialorder %v2023_v0, inf }
 0x11d   : > { %v2115_v40 = vadd.f32 1e-08, %v825_v10  ;;  %v855_v53 = vsel %vm853_vm12, %v854_v56, %v852_v11  ;;  %v848_v35 = vsel %vm846_vm13, %v847_v34, %v845_v42  ;;  %v2117_v6 = vadd.f32 1e-08, %v824_v1 }
 0x11e   : > { %v705_v29 = vmul.f32 %v673_v43, %v673_v43  ;;  %v704_v38 = vmul.f32 %v672_v28, %v672_v28  ;;  %v857_v9 = vmul.f32 %v1220_v45, %v2040_v54  ;;  %1223 = vrsqrt.f32 %v2106_v46 }
 0x11f   : > { %v2122_v41 = vadd.f32 1e-08, %v827_v20  ;;  %v866_v55 = vsel %vm865_vm14, %v2023_v0, %v864_v58  ;;  %vm867_vm15 = vcmp.eq.f32.partialorder %v2023_v0, 0.0  ;;  %v868_v48 = vand.u32 2147483648, %v2023_v0 }
 0x120   : > { %v539_v17 = vpop.permute.xlu1 %538  ;;  %v537_v4 = vpop.permute.xlu0 %536  ;;  %v721_v32 = vadd.f32 %v705_v29, %v2025_v50  ;;  %v720_v31 = vadd.f32 %v704_v38, %v2027_v7  ;;  %v2128_v44 = vadd.f32 1e-08, %v826_v30  ;;  %vm858_vm1 = vcmp.eq.f32.partialorder %v2040_v54, inf }
 0x121   : > { %vm860_vm2 = vcmp.eq.f32.partialorder %v2040_v54, 0.0  ;;  %v861_v50 = vand.u32 2147483648, %v2040_v54  ;;  %1225 = vrsqrt.f32 %v2115_v40  ;;  %v938_v7 = vsel %vm328_vm0, %v855_v53, 0.0  ;;  %v1222_v16 = vpop.eup %1221 }
 0x122   : > { %v927_v25 = vsel %vm328_vm0, %v848_v35, 0.0  ;;  %1227 = vrsqrt.f32 %v2117_v6  ;;  %v829_v5 = vadd.f32 %v2029_v37, %v721_v32  ;;  %v869_v0 = vsel %vm867_vm15, %v868_v48, %v866_v55 }
 0x123   : > { %v859_v2 = vsel %vm858_vm1, %v2040_v54, %v857_v9  ;;  %1229 = vrsqrt.f32 %v2122_v41  ;;  %v828_v23 = vadd.f32 %v2031_v61, %v720_v31  ;;  %vm879_vm3 = vcmp.eq.f32.partialorder %v2076_v39, inf }
 0x124   : > { %v576_v21 = vpop.permute.xlu1 %575  ;;  %v574_v33 = vpop.permute.xlu0 %573  ;;  %1231 = vrsqrt.f32 %v2128_v44  ;;  %v558_v56 = vsel %vm556_vm8, %v511_v49, %v1764_v12  ;;  %vm881_vm4 = vcmp.eq.f32.partialorder %v2076_v39, 0.0  ;;  %v939_v10 = vsel %vm328_vm0, %v869_v0, 0.0 }
 0x125   : > { %v623_v37 = vsel %vm621_vm9, %v1764_v12, %v576_v21  ;;  %v622_v3 = vsel %vm621_vm9, %v1767_v13, %v574_v33  ;;  %v862_v49 = vsel %vm860_vm2, %v861_v50, %v859_v2  ;;  %v878_v26 = vmul.f32 %v1222_v16, %v2076_v39 }
 0x126   : > { %v639_v47 = vsub.f32 %v558_v56, %v623_v37  ;;  %v2158_v12 = vadd.f32 1e-08, %v829_v5  ;;  %v2160_v43 = vadd.f32 1e-08, %v828_v23  ;;  %v557_v11 = vsel %vm556_vm8, %v2091_v51, %v1767_v13 }
 0x127   : > { %v572_v1 = vsel %vm556_vm8, %v539_v17, %v1774_v14  ;;  %v571_v27 = vsel %vm556_vm8, %v537_v4, %v1777_v15  ;;  %v638_v54 = vsub.f32 %v557_v11, %v622_v3  ;;  %v928_v45 = vsel %vm328_vm0, %v862_v49, 0.0 }
 0x128   : > { %v604_v59 = vpop.permute.xlu1 %603  ;;  %v602_v22 = vpop.permute.xlu0 %601  ;;  %v661_v28 = vmul.f32 %v1841_v57, %v639_v47  ;;  %v882_v34 = vand.u32 2147483648, %v2076_v39  ;;  %vm872_vm5 = vcmp.eq.f32.partialorder %v2106_v46, inf  ;;  %v875_v13 = vand.u32 2147483648, %v2106_v46 }
 0x129   : > { %v637_v61 = vsel %vm621_vm9, %v1774_v14, %v604_v59  ;;  %v636_v18 = vsel %vm621_vm9, %v1777_v15, %v602_v22  ;;  %v1224_v29 = vpop.eup %1223  ;;  %1233 = vrsqrt.f32 %v2158_v12  ;;  %v660_v51 = vmul.f32 %v1841_v57, %v638_v54 }
 0x12a   : > { %v653_v42 = vsub.f32 %v572_v1, %v637_v61  ;;  %v652_v20 = vsub.f32 %v571_v27, %v636_v18  ;;  %v693_v14 = vmul.f32 %v661_v28, %v661_v28  ;;  %v2177_v4 = vadd.f32 %v939_v10, %v938_v7 }
 0x12b   : > { %v1226_v17 = vpop.eup %1225  ;;  %v880_v58 = vsel %vm879_vm3, %v2076_v39, %v878_v26  ;;  %vm874_vm6 = vcmp.eq.f32.partialorder %v2106_v46, 0.0  ;;  %1235 = vrsqrt.f32 %v2160_v43  ;;  %v871_v53 = vmul.f32 %v1224_v29, %v2106_v46 }
 0x12c   : > { %v675_v15 = vmul.f32 %v1841_v57, %v653_v42  ;;  %v674_v30 = vmul.f32 %v1841_v57, %v652_v20  ;;  %v1228_v38 = vpop.eup %1227  ;;  %v709_v35 = vadd.f32 %v693_v14, %v2037_v60  ;;  %v692_v32 = vmul.f32 %v660_v51, %v660_v51 }
 0x12d   : > { %v1230_v31 = vpop.eup %1229  ;;  %v929_v21 = vadd.f32 %v928_v45, %v927_v25  ;;  %vm893_vm7 = vcmp.eq.f32.partialorder %v2115_v40, inf  ;;  %vm895_vm8 = vcmp.eq.f32.partialorder %v2115_v40, 0.0  ;;  %v883_v48 = vsel %vm881_vm4, %v882_v34, %v880_v58 }
 0x12e   : > { %v707_v9 = vmul.f32 %v675_v15, %v675_v15  ;;  %v706_v33 = vmul.f32 %v674_v30, %v674_v30  ;;  %v1232_v55 = vpop.eup %1231  ;;  %v896_v57 = vand.u32 2147483648, %v2115_v40  ;;  %v735_v50 = vadd.f32 %v2061_v36, %v709_v35 }
 0x12f   : > { %v708_v7 = vadd.f32 %v692_v32, %v2043_v62  ;;  %v892_v60 = vmul.f32 %v1226_v17, %v2115_v40  ;;  %v885_v5 = vmul.f32 %v1228_v38, %v2117_v6  ;;  %v873_v0 = vsel %vm872_vm5, %v2106_v46, %v871_v53 }
 0x130   : > { %v723_v25 = vadd.f32 %v707_v9, %v2065_v19  ;;  %v722_v16 = vadd.f32 %v706_v33, %v2069_v52  ;;  %vm886_vm9 = vcmp.eq.f32.partialorder %v2117_v6, inf  ;;  %v2202_v39 = vadd.f32 1e-08, %v735_v50 }
 0x131   : > { %v734_v36 = vadd.f32 %v2063_v8, %v708_v7  ;;  %v906_v62 = vmul.f32 %v1230_v31, %v2122_v41  ;;  %v899_v2 = vmul.f32 %v1232_v55, %v2128_v44  ;;  %v941_v52 = vsel %vm328_vm0, %v883_v48, 0.0 }
 0x132   : > { %v763_v23 = vadd.f32 %v2067_v63, %v723_v25  ;;  %v762_v19 = vadd.f32 %v2074_v24, %v722_v16  ;;  %vm888_vm10 = vcmp.eq.f32.partialorder %v2117_v6, 0.0  ;;  %v889_v59 = vand.u32 2147483648, %v2117_v6 }
 0x133   : > { %1237 = vrsqrt.f32 %v2202_v39  ;;  %v894_v8 = vsel %vm893_vm7, %v2115_v40, %v892_v60  ;;  %v887_v22 = vsel %vm886_vm9, %v2117_v6, %v885_v5  ;;  %v2217_v56 = vadd.f32 1e-08, %v734_v36  ;;  %v1234_v63 = vpop.eup %1233 }
 0x134   : > { %v2219_v37 = vadd.f32 1e-08, %v763_v23  ;;  %v876_v24 = vsel %vm874_vm6, %v875_v13, %v873_v0  ;;  %vm907_vm11 = vcmp.eq.f32.partialorder %v2122_v41, inf  ;;  %vm900_vm12 = vcmp.eq.f32.partialorder %v2128_v44, inf }
 0x135   : > { %v2225_v47 = vadd.f32 1e-08, %v762_v19  ;;  %v1236_v3 = vpop.eup %1235  ;;  %v908_v61 = vsel %vm907_vm11, %v2122_v41, %v906_v62  ;;  %v910_v18 = vand.u32 2147483648, %v2122_v41  ;;  %v901_v10 = vsel %vm900_vm12, %v2128_v44, %v899_v2 }
 0x136   : > { %1239 = vrsqrt.f32 %v2217_v56  ;;  %v897_v49 = vsel %vm895_vm8, %v896_v57, %v894_v8  ;;  %v890_v46 = vsel %vm888_vm10, %v889_v59, %v887_v22  ;;  %v903_v26 = vand.u32 2147483648, %v2128_v44  ;;  %v951_v59 = vld [vmem:[%s1792_s9] sm:$0xff] }
 0x137   : > { %1241 = vrsqrt.f32 %v2219_v37  ;;  %v930_v11 = vsel %vm328_vm0, %v876_v24, 0.0  ;;  %vm909_vm13 = vcmp.eq.f32.partialorder %v2122_v41, 0.0  ;;  %vm902_vm14 = vcmp.eq.f32.partialorder %v2128_v44, 0.0 }
 0x138   : > { %1243 = vrsqrt.f32 %v2225_v47  ;;  %v911_v1 = vsel %vm909_vm13, %v910_v18, %v908_v61  ;;  %v904_v27 = vsel %vm902_vm14, %v903_v26, %v901_v10  ;;  %v920_v40 = vmul.f32 %v1234_v63, %v2158_v12 }
 0x139   : > { %v913_v28 = vmul.f32 %v1236_v3, %v2160_v43  ;;  %v943_v6 = vsel %vm328_vm0, %v897_v49, 0.0  ;;  %v932_v54 = vsel %vm328_vm0, %v890_v46, 0.0  ;;  %v942_v42 = vadd.f32 %v941_v52, %v2177_v4  ;;  %v952_v52 = vld [vmem:[%s1792_s9 + $0x8] sm:$0xff] }
 0x13a   : > { %v931_v20 = vadd.f32 %v930_v11, %v929_v21  ;;  %v945_v29 = vsel %vm328_vm0, %v911_v1, 0.0  ;;  %v934_v41 = vsel %vm328_vm0, %v904_v27, 0.0  ;;  %vm921_vm15 = vcmp.eq.f32.partialorder %v2158_v12, inf }
 0x13b   : > { %vm914_vm1 = vcmp.eq.f32.partialorder %v2160_v43, inf  ;;  %v944_v45 = vadd.f32 %v943_v6, %v942_v42  ;;  %v922_v13 = vsel %vm921_vm15, %v2158_v12, %v920_v40  ;;  %vm923_vm2 = vcmp.eq.f32.partialorder %v2158_v12, 0.0 }
 0x13c   : > { %v933_v34 = vadd.f32 %v932_v54, %v931_v20  ;;  %v915_v14 = vsel %vm914_vm1, %v2160_v43, %v913_v28  ;;  %v924_v51 = vand.u32 2147483648, %v2158_v12  ;;  %v917_v15 = vand.u32 2147483648, %v2160_v43 }
 0x13d   : > { %v1238_v44 = vpop.eup %1237  ;;  %vm916_vm3 = vcmp.eq.f32.partialorder %v2160_v43, 0.0  ;;  %vm747_vm4 = vcmp.eq.f32.partialorder %v2202_v39, inf  ;;  %v946_v58 = vadd.f32 %v945_v29, %v944_v45  ;;  %vm749_vm5 = vcmp.eq.f32.partialorder %v2202_v39, 0.0 }
 0x13e   : > { %v746_v17 = vmul.f32 %v1238_v44, %v2202_v39  ;;  %v935_v4 = vadd.f32 %v934_v41, %v933_v34  ;;  %v925_v38 = vsel %vm923_vm2, %v924_v51, %v922_v13  ;;  %v918_v53 = vsel %vm916_vm3, %v917_v15, %v915_v14 }
 0x13f   : > { %v750_v35 = vand.u32 2147483648, %v2202_v39  ;;  %vm740_vm6 = vcmp.eq.f32.partialorder %v2217_v56, inf  ;;  %vm742_vm7 = vcmp.eq.f32.partialorder %v2217_v56, 0.0  ;;  %v743_v43 = vand.u32 2147483648, %v2217_v56 }
 0x140   : > { %v1240_v30 = vpop.eup %1239  ;;  %v748_v31 = vsel %vm747_vm4, %v2202_v39, %v746_v17  ;;  %vm775_vm8 = vcmp.eq.f32.partialorder %v2219_v37, inf  ;;  %vm777_vm9 = vcmp.eq.f32.partialorder %v2219_v37, 0.0  ;;  %v778_v55 = vand.u32 2147483648, %v2219_v37 }
 0x141   : > { %v1242_v32 = vpop.eup %1241  ;;  %v739_v12 = vmul.f32 %v1240_v30, %v2217_v56  ;;  %v947_v57 = vsel %vm328_vm0, %v925_v38, 0.0  ;;  %vm768_vm10 = vcmp.eq.f32.partialorder %v2225_v47, inf  ;;  %v771_v7 = vand.u32 2147483648, %v2225_v47 }
 0x142   : > { %v1244_v9 = vpop.eup %1243  ;;  %v774_v21 = vmul.f32 %v1242_v32, %v2219_v37  ;;  %v936_v60 = vsel %vm328_vm0, %v918_v53, 0.0  ;;  %v751_v5 = vsel %vm749_vm5, %v750_v35, %v748_v31  ;;  %vm770_vm11 = vcmp.eq.f32.partialorder %v2225_v47, 0.0 }
 0x143   : > { %v741_v33 = vsel %vm740_vm6, %v2217_v56, %v739_v12  ;;  %v767_v48 = vmul.f32 %v1244_v9, %v2225_v47  ;;  %v948_v2 = vadd.f32 %v947_v57, %v946_v58  ;;  %v937_v19 = vadd.f32 %v936_v60, %v935_v4 }
 0x144   : > { %v776_v50 = vsel %vm775_vm8, %v2219_v37, %v774_v21  ;;  %v744_v0 = vsel %vm742_vm7, %v743_v43, %v741_v33 }
 0x145   : > { %v779_v25 = vsel %vm777_vm9, %v778_v55, %v776_v50  ;;  %v769_v16 = vsel %vm768_vm10, %v2225_v47, %v767_v48 }
 0x146   : > { %v772_v36 = vsel %vm770_vm11, %v771_v7, %v769_v16  ;;  %v781_v62 = vadd.f32 %v779_v25, %v751_v5 }
 0x147   : > { %v780_v23 = vadd.f32 %v772_v36, %v744_v0 }
 0x148   : > { %v950_v39 = vadd.f32 %v948_v2, %v781_v62 }
 0x149   : > { %v949_v8 = vadd.f32 %v937_v19, %v780_v23 }
 0x14a   : > { %v954_v22 = vadd.f32 %v952_v52, %v950_v39 }
 0x14b   : > { %v953_v56 = vadd.f32 %v951_v59, %v949_v8 }
 0x14c   : > { %956 = vst.msk [vmem:[%s1792_s9 + $0x8] sm:$0xff] %vm328_vm0, %v954_v22 }
 0x14d   : > { %955 = vst.msk [vmem:[%s1792_s9] sm:$0xff] %vm328_vm0, %v953_v56 }
 0x14e   : > { %1348 = shalt.err (!%p1345_p12)
}
 0x14f   : > { %s1349_s10 = scalar_lea.hbm %s2289_s29, 256  ;;  %s1353_s6 = scalar_lea.hbm %s2346_s3, 1536 }
 0x150   : > { %p1350_p7 = scmp.ne.s32.totalorder %s2289_s29, %s1349_s10  ;;  %p1354_p4 = scmp.lt.u32.totalorder %s2289_s29, %s2346_s3 }
 0x151   : > { %p1355_p1 = scmp.lt.u32.totalorder %s1353_s6, %s1349_s10  ;;  %p1357_p13 = scmp.lt.u32.totalorder %s1349_s10, %s2289_s29 }
 0x152   : > { %p1351_p11 = pnand %p1350_p7, %p2373_p5 }
 0x153   : > { %p1356_p0 = por %p1355_p1, %p1354_p4 }
 0x154   : > { %p1352_p2 = pneg %p1351_p11 }
 0x155   : > { %p1358_p8 = por %p1357_p13, %p1356_p0 }
 0x157   : > { %p1359_p9 = pnand %p1358_p8, %p1352_p2 }
 0x159   : > { %1362 = shalt.err (!%p1359_p9)
}
 0x15a   : > { %s1433_s19 = smov 128   ;;  %s1434_s21 = smov 8  }
 0x15b   : > { %1139 = dma.vmem_to_hbm [thread:$0]  (%p2373_p5), %s2291_s7, 256, %s2289_s29, %s958_s15, %s1433_s19, %s1433_s19, %s1434_s21  }
 0x15c PF: > { %p1156_p3 = scmp.ge.s32.totalorder %s1421_s17, 2  ;;  %s986_s18 = sand.u32 1, %s1401_s12  }
 0x15d   : > { %p2374_p6 = scmp.ne.s32.totalorder %s2364_s27, 0  ;;  %s987_s24 = scalar_lea.sflag [#allocation4], %s986_s18 }
 0x15f   : > { %p1152_p10 = pnand %p1156_p3, %p2374_p6 }
 0x161   : > { %1396 = dma.done.wait (!%p1152_p10), %s987_s24, 256  }
 0x162   : > { %1398 = vsyncadd (!%p1152_p10), %s987_s24, 4294967040  ;;  %s22_s17 = sadd.s32 1, %s1421_s17   ;;  %s2375_s9 = sld [smem:[#allocation12_spill]] }
 0x163   : > { %p19_p12 = scmp.ge.s32.totalorder %s22_s17, 8   ;;  %s2376_s14 = sld [smem:[#allocation15_spill]] }
 0x164   : > { %s2377_s15 = sld [smem:[#allocation13_spill]]  ;;  %s2378_s16 = sld [smem:[#allocation14_spill]] }
 0x165   : > { %s2379_s12 = smov %s1405_s13  ;;  %21 = sbr.rel (!%p19_p12) target bundleno = 10 (0xa), region = 105 }
 0x168   : > { %s2380_s13 = smov %s2375_s9 }
 0x16c   :  { %992 = vsyncpa [#allocation3], 1 }
 0x16d   :  { %994 = vsyncpa [#allocation3 + $0x1], 1 }
 0x16e   :  { %995 = vsyncpa [#allocation6], 1 }
 0x16f   :  { %997 = vsyncpa [#allocation6 + $0x1], 1 }
 0x170   :  { %998 = vsyncpa [#allocation4], 1 }
 0x171   :  { %1000 = vsyncpa [#allocation4 + $0x1], 1 }

</bundles_post_ra>
